<compile_context>
chip_gen: v6e
topology: v6e:2x2x1
jax: 0.10.0
libtpu: 0.0.40
codegen_flags: <defaults>
</compile_context>

<pallas_src>
import functools

import jax
import jax.numpy as jnp
from jax.experimental import pallas as pl
from jax.experimental.pallas import tpu as pltpu


def _round_up(x, m):
    return (x + m - 1) // m * m


def _vmem_budget_bytes():
    """~70% of physical VMEM (64 MiB on v7x, 128 MiB on v5e/v6e); safe fallback."""
    try:
        cap = int(pltpu.get_tpu_info().vmem_capacity_bytes)
        if cap <= 0:
            raise ValueError
    except Exception:
        cap = 64 * 1024 * 1024            # v7x-safe fallback
    return int(cap * 0.7)


def _pick_vocab_tile(Ip, Hp, Op0, Bp):
    """Largest 128-multiple vocab tile whose double-buffered W_out stream plus the
    VMEM-resident operands fits the per-chip budget (capped at 4096 lanes)."""
    budget = _vmem_budget_bytes()
    # Bytes that do not scale with the W_out tile (x2 for potential double buffers):
    # gate weights + bias + activations/states, plus staged logits + scratch.
    fixed = 2 * ((Ip + Hp) * 4 * Hp * 2 + 4 * Hp * 4
                 + Bp * Ip * 2 + 4 * Bp * Hp * 4)
    fixed += Bp * Op0 * 4 + Bp * Hp * 2 + 2 * Bp * 128 * 4
    avail = max(budget - fixed - (2 << 20), 2 * 2 * Hp * 2 * 128)
    per_lane = 2 * (Hp * 2 + 4)           # 2 buffers x (bf16 W_out column + f32 bias)
    lanes = (avail // per_lane) // 128 * 128
    return int(max(128, min(Op0, lanes, 4096)))


def _decoder_cell_kernel(x_ref, h0_ref, c0_ref,
                         wih_ref, whh_ref, b_ref,
                         wout_ref, bout_ref,
                         logp_ref, h1_ref, c1_ref,
                         h1bf_scr, m_scr, l_scr,
                         *, hidden_size, num_tiles):
    """LSTM cell (once) + streamed output projection + online log-softmax."""
    Hp = hidden_size
    j = pl.program_id(0)

    @pl.when(j == 0)
    def _():
        # LSTM cell math runs once; its operands stay VMEM-resident across the
        # vocab loop (constant index_maps).  MXU accumulates in f32.
        gates = (jnp.dot(x_ref[...], wih_ref[...],
                         preferred_element_type=jnp.float32)
                 + jnp.dot(h0_ref[...].astype(jnp.bfloat16), whh_ref[...],
                           preferred_element_type=jnp.float32)
                 + b_ref[...])
        # 128-lane-aligned gate slices (PyTorch gate order i, f, g, o).
        i_g = jax.nn.sigmoid(gates[:, 0 * Hp:1 * Hp])
        f_g = jax.nn.sigmoid(gates[:, 1 * Hp:2 * Hp])
        g_g = jnp.tanh(gates[:, 2 * Hp:3 * Hp])
        o_g = jax.nn.sigmoid(gates[:, 3 * Hp:4 * Hp])
        c1 = f_g * c0_ref[...] + i_g * g_g
        h1 = o_g * jnp.tanh(c1)
        h1_ref[...] = h1.astype(h1_ref.dtype)
        c1_ref[...] = c1.astype(c1_ref.dtype)
        h1bf_scr[...] = h1.astype(jnp.bfloat16)
        m_scr[...] = jnp.full_like(m_scr, -jnp.inf)
        l_scr[...] = jnp.zeros_like(l_scr)

    # Streamed projection tile (bf16 MXU, f32 acc) + online log-sum-exp update.
    logits = jnp.dot(h1bf_scr[...], wout_ref[...],
                     preferred_element_type=jnp.float32) + bout_ref[...]
    m_old = m_scr[...]
    m_new = jnp.maximum(m_old, jnp.max(logits, axis=1, keepdims=True))
    l_scr[...] = (l_scr[...] * jnp.exp(m_old - m_new)
                  + jnp.sum(jnp.exp(logits - m_new), axis=1, keepdims=True))
    m_scr[...] = m_new
    # Stage raw logits in the VMEM-resident (num_tiles, Bp, TO) output block.
    logp_ref[j] = logits

    @pl.when(j == num_tiles - 1)
    def _():
        lse = m_scr[...] + jnp.log(l_scr[...])        # (Bp, 1)
        for t in range(num_tiles):                    # static unroll, lane-dense RMW
            logp_ref[t] = logp_ref[t] - lse


def init_params(key, input_size, hidden_size, output_size):
    """PyTorch-style uniform(-1/sqrt(H), 1/sqrt(H)) init; raw (unpadded, f32) weights."""
    ks = jax.random.split(key, 6)
    bound = 1.0 / jnp.sqrt(jnp.float32(hidden_size))
    u = lambda k, shape: jax.random.uniform(k, shape, jnp.float32, -bound, bound)
    wih_t = u(ks[0], (input_size, 4 * hidden_size))     # W_ih^T
    whh_t = u(ks[1], (hidden_size, 4 * hidden_size))    # W_hh^T
    b_ih = u(ks[2], (1, 4 * hidden_size))
    b_hh = u(ks[3], (1, 4 * hidden_size))
    wout_t = u(ks[4], (hidden_size, output_size))       # W_out^T
    bout = u(ks[5], (1, output_size))
    return {"wih_t": wih_t, "whh_t": whh_t, "bias": b_ih + b_hh,
            "wout_t": wout_t, "bout": bout}


def pack_params(raw, input_size, hidden_size, output_size, *, batch_hint=16):
    """Pad to (8,128)/(16,128) grains (per-gate), choose a vocab tile, cast matmul
    weights to bf16.  Padding is numerically inert (zero weights, -1e30 vocab bias)."""
    I, H, O = input_size, hidden_size, output_size
    Ip = _round_up(I, 128)
    Hp = _round_up(H, 128)
    Op0 = _round_up(O, 128)
    Bp = max(_round_up(batch_hint, 16), 16)

    TO = _pick_vocab_tile(Ip, Hp, Op0, Bp)
    Op = _round_up(Op0, TO)

    def pad_gates(w, rows, rows_p):
        # (rows, 4H) -> (rows_p, 4*Hp) with each gate block padded to Hp lanes.
        w4 = w.reshape(rows, 4, H)
        out = jnp.zeros((rows_p, 4, Hp), w.dtype).at[:rows, :, :H].set(w4)
        return out.reshape(rows_p, 4 * Hp)

    wih = pad_gates(raw["wih_t"], I, Ip).astype(jnp.bfloat16)
    whh = pad_gates(raw["whh_t"], H, Hp).astype(jnp.bfloat16)

    bias4 = raw["bias"].reshape(1, 4, H)
    bias = (jnp.zeros((1, 4, Hp), jnp.float32)
            .at[:, :, :H].set(bias4).reshape(1, 4 * Hp))

    wout = (jnp.zeros((Hp, Op), jnp.float32)
            .at[:H, :O].set(raw["wout_t"]).astype(jnp.bfloat16))
    # Padded vocab slots get a huge negative bias so they vanish in log-softmax
    # (f32 logits throughout; do not move this sentinel to bf16).
    bout = jnp.full((1, Op), -1e30, jnp.float32).at[:, :O].set(raw["bout"])

    return {"wih": wih, "whh": whh, "bias": bias, "wout": wout, "bout": bout,
            "sizes": (I, H, O, Ip, Hp, Op, TO)}


def decoder_cell_forward(x, hidden, packed):
    """Pallas DecoderCell.forward.

    x      : (B, 1, input_size)
    hidden : (h0, c0), each (1, B, hidden_size)
    returns (logp (B, output_size), (h1, c1) each (1, B, hidden_size))
    """
    h0, c0 = hidden
    B, S, _ = x.shape
    assert S == 1, "DecoderCell processes a single decoding step"
    I, H, O, Ip, Hp, Op, TO = packed["sizes"]
    NT = Op // TO
    Bp = max(_round_up(B, 16), 16)      # full bf16 [16,128] vregs on the batch axis

    # Zero-pad activations / states.  Padded batch rows produce garbage h1/c1 that is
    # sliced off below (zero them if state is ever kept resident across steps).
    x2 = jnp.zeros((Bp, Ip), jnp.bfloat16).at[:B, :I].set(
        x.reshape(B, I).astype(jnp.bfloat16))
    h02 = jnp.zeros((Bp, Hp), jnp.float32).at[:B, :H].set(h0.reshape(B, H))
    c02 = jnp.zeros((Bp, Hp), jnp.float32).at[:B, :H].set(c0.reshape(B, H))

    const2 = lambda shape: pl.BlockSpec(shape, lambda j: (0, 0))

    flops = 2 * Bp * (Ip + Hp) * 4 * Hp + 2 * Bp * Hp * Op
    transcendentals = 5 * Bp * Hp + Bp * Op
    bytes_accessed = (Bp * Ip * 2 + 2 * Bp * Hp * 4           # x, h0, c0
                      + (Ip + Hp) * 4 * Hp * 2 + 4 * Hp * 4   # gate weights, bias
                      + Hp * Op * 2 + Op * 4                  # W_out stream, b_out
                      + Bp * Op * 4 + 2 * Bp * Hp * 4)        # outputs

    vmem_limit = max(32 * 1024 * 1024, _vmem_budget_bytes())

    kernel = functools.partial(_decoder_cell_kernel, hidden_size=Hp, num_tiles=NT)

    logp3, h1, c1 = pl.pallas_call(
        kernel,
        out_shape=(
            jax.ShapeDtypeStruct((NT, Bp, TO), jnp.float32),   # staged/normalized logp
            jax.ShapeDtypeStruct((Bp, Hp), jnp.float32),       # h1 (aliased with h0)
            jax.ShapeDtypeStruct((Bp, Hp), jnp.float32),       # c1 (aliased with c0)
        ),
        grid_spec=pltpu.PrefetchScalarGridSpec(
            num_scalar_prefetch=0,
            grid=(NT,),
            in_specs=[
                const2((Bp, Ip)),                              # x           bf16
                const2((Bp, Hp)),                              # h0          f32
                const2((Bp, Hp)),                              # c0          f32
                const2((Ip, 4 * Hp)),                          # W_ih^T      bf16
                const2((Hp, 4 * Hp)),                          # W_hh^T      bf16
                const2((1, 4 * Hp)),                           # b_ih + b_hh f32
                pl.BlockSpec((Hp, TO), lambda j: (0, j)),      # W_out^T tile (streamed)
                pl.BlockSpec((1, TO), lambda j: (0, j)),       # b_out tile   (streamed)
            ],
            out_specs=[
                pl.BlockSpec((NT, Bp, TO), lambda j: (0, 0, 0)),
                const2((Bp, Hp)),
                const2((Bp, Hp)),
            ],
            scratch_shapes=[
                pltpu.VMEM((Bp, Hp), jnp.bfloat16),            # h1 in bf16 for the MXU
                pltpu.VMEM((Bp, 1), jnp.float32),              # running max
                pltpu.VMEM((Bp, 1), jnp.float32),              # running sum
            ],
        ),
        input_output_aliases={1: 1, 2: 2},                     # h0->h1, c0->c1 in place
        cost_estimate=pl.CostEstimate(flops=flops,
                                      transcendentals=transcendentals,
                                      bytes_accessed=bytes_accessed),
        compiler_params=pltpu.CompilerParams(
            dimension_semantics=("arbitrary",),                # online-softmax reduction
            vmem_limit_bytes=vmem_limit),
    )(x2, h02, c02, packed["wih"], packed["whh"], packed["bias"],
      packed["wout"], packed["bout"])

    # Layout plumbing only: (NT, Bp, TO) -> (Bp, Op), then strip padding.
    logp = jnp.moveaxis(logp3, 0, 1).reshape(Bp, Op)[:B, :O]
    return (logp,
            (h1[:B, :H].reshape(1, B, H), c1[:B, :H].reshape(1, B, H)))


def _reference_forward(x, hidden, raw, hidden_size):
    """Pure-JAX reference (emulating the kernel's bf16 matmul inputs, f32 accumulation)."""
    h0, c0 = hidden
    B = x.shape[0]
    H = hidden_size
    x2 = x.reshape(B, -1).astype(jnp.bfloat16)
    h02 = h0.reshape(B, H)
    c02 = c0.reshape(B, H)
    gates = (jnp.dot(x2, raw["wih_t"].astype(jnp.bfloat16),
                     preferred_element_type=jnp.float32)
             + jnp.dot(h02.astype(jnp.bfloat16), raw["whh_t"].astype(jnp.bfloat16),
                       preferred_element_type=jnp.float32)
             + raw["bias"])
    i_g = jax.nn.sigmoid(gates[:, 0 * H:1 * H])
    f_g = jax.nn.sigmoid(gates[:, 1 * H:2 * H])
    g_g = jnp.tanh(gates[:, 2 * H:3 * H])
    o_g = jax.nn.sigmoid(gates[:, 3 * H:4 * H])
    c1 = f_g * c02 + i_g * g_g
    h1 = o_g * jnp.tanh(c1)
    logits = jnp.dot(h1.astype(jnp.bfloat16), raw["wout_t"].astype(jnp.bfloat16),
                     preferred_element_type=jnp.float32) + raw["bout"]
    logp = jax.nn.log_softmax(logits, axis=1)
    return logp, (h1.reshape(1, B, H), c1.reshape(1, B, H))


if __name__ == "__main__":
    batch = 2
    input_size = 8
    hidden_size = 32
    output_size = 16

    key = jax.random.PRNGKey(0)
    k_p, k_x, k_h, k_c = jax.random.split(key, 4)

    raw = init_params(k_p, input_size, hidden_size, output_size)
    packed = pack_params(raw, input_size, hidden_size, output_size, batch_hint=batch)

    x = jax.random.normal(k_x, (batch, 1, input_size), jnp.float32)
    h0 = jax.random.normal(k_h, (1, batch, hidden_size), jnp.float32)
    c0 = jax.random.normal(k_c, (1, batch, hidden_size), jnp.float32)

    logp, (h1, c1) = decoder_cell_forward(x, (h0, c0), packed)
    jax.block_until_ready((logp, h1, c1))

    ref_logp, (ref_h1, ref_c1) = _reference_forward(x, (h0, c0), raw, hidden_size)

    assert logp.shape == (batch, output_size)
    assert h1.shape == (1, batch, hidden_size) and c1.shape == (1, batch, hidden_size)
    assert jnp.allclose(logp, ref_logp, atol=2e-3), "log-softmax output mismatch"
    assert jnp.allclose(h1, ref_h1, atol=2e-3), "hidden state mismatch"
    assert jnp.allclose(c1, ref_c1, atol=2e-3), "cell state mismatch"

    print("KERNEL_OK")
</pallas_src>

<mosaic_0001>
module attributes {stable_mosaic.version = 11 : i64} {
  func.func @_decoder_cell_kernel(%arg0: i32, %arg1: memref<16x128xbf16, #tpu.memory_space<vmem>>, %arg2: memref<16x128xf32, #tpu.memory_space<vmem>>, %arg3: memref<16x128xf32, #tpu.memory_space<vmem>>, %arg4: memref<128x512xbf16, #tpu.memory_space<vmem>>, %arg5: memref<128x512xbf16, #tpu.memory_space<vmem>>, %arg6: memref<1x512xf32, #tpu.memory_space<vmem>>, %arg7: memref<128x128xbf16, #tpu.memory_space<vmem>>, %arg8: memref<1x128xf32, #tpu.memory_space<vmem>>, %arg9: memref<1x16x128xf32, #tpu.memory_space<vmem>>, %arg10: memref<16x128xf32, #tpu.memory_space<vmem>>, %arg11: memref<16x128xf32, #tpu.memory_space<vmem>>, %arg12: memref<16x128xbf16, #tpu.memory_space<vmem>>, %arg13: memref<16x1xf32, #tpu.memory_space<vmem>>, %arg14: memref<16x1xf32, #tpu.memory_space<vmem>>) attributes {dimension_semantics = [#tpu.dimension_semantics<arbitrary>], iteration_bounds = array<i64: 1>, scalar_prefetch = 0 : i64, scratch_operands = 3 : i64, tpu.core_type = #tpu.core_type<tc>, window_params = [{pipeline_mode = #tpu.pipeline_mode<synchronous>, transform_indices = @transform_0, window_bounds = array<i64: 16, 128>}, {pipeline_mode = #tpu.pipeline_mode<synchronous>, transform_indices = @transform_1, window_bounds = array<i64: 16, 128>}, {pipeline_mode = #tpu.pipeline_mode<synchronous>, transform_indices = @transform_2, window_bounds = array<i64: 16, 128>}, {pipeline_mode = #tpu.pipeline_mode<synchronous>, transform_indices = @transform_3, window_bounds = array<i64: 128, 512>}, {pipeline_mode = #tpu.pipeline_mode<synchronous>, transform_indices = @transform_4, window_bounds = array<i64: 128, 512>}, {pipeline_mode = #tpu.pipeline_mode<synchronous>, transform_indices = @transform_5, window_bounds = array<i64: 1, 512>}, {transform_indices = @transform_6, window_bounds = array<i64: 128, 128>}, {transform_indices = @transform_7, window_bounds = array<i64: 1, 128>}, {pipeline_mode = #tpu.pipeline_mode<synchronous>, transform_indices = @transform_8, window_bounds = array<i64: 1, 16, 128>}, {pipeline_mode = #tpu.pipeline_mode<synchronous>, transform_indices = @transform_9, window_bounds = array<i64: 16, 128>}, {pipeline_mode = #tpu.pipeline_mode<synchronous>, transform_indices = @transform_10, window_bounds = array<i64: 16, 128>}]} {
    %c0_i32 = arith.constant 0 : i32
    %0 = arith.cmpi eq, %arg0, %c0_i32 : i32
    %1 = arith.extui %0 : i1 to i32
    %c0_i32_0 = arith.constant 0 : i32
    %2 = arith.cmpi ne, %1, %c0_i32_0 : i32
    scf.if %2 {
      %c0_20 = arith.constant 0 : index
      %c0_21 = arith.constant 0 : index
      %32 = vector.load %arg1[%c0_20, %c0_21] : memref<16x128xbf16, #tpu.memory_space<vmem>>, vector<16x128xbf16>
      %c0_22 = arith.constant 0 : index
      %c0_23 = arith.constant 0 : index
      %33 = vector.load %arg4[%c0_22, %c0_23] : memref<128x512xbf16, #tpu.memory_space<vmem>>, vector<128x512xbf16>
      %cst_24 = arith.constant dense<0.000000e+00> : vector<16x512xf32>
      %34 = tpu.matmul %32, %33, %cst_24 {dimension_numbers = #tpu.dot_dimension_numbers<[1], [0], [0], [1], [0, 0, 1, 1], [], []>} : vector<16x128xbf16>, vector<128x512xbf16>, vector<16x512xf32> -> vector<16x512xf32>
      %c0_25 = arith.constant 0 : index
      %c0_26 = arith.constant 0 : index
      %35 = vector.load %arg2[%c0_25, %c0_26] : memref<16x128xf32, #tpu.memory_space<vmem>>, vector<16x128xf32>
      %36 = arith.truncf %35 : vector<16x128xf32> to vector<16x128xbf16>
      %c0_27 = arith.constant 0 : index
      %c0_28 = arith.constant 0 : index
      %37 = vector.load %arg5[%c0_27, %c0_28] : memref<128x512xbf16, #tpu.memory_space<vmem>>, vector<128x512xbf16>
      %cst_29 = arith.constant dense<0.000000e+00> : vector<16x512xf32>
      %38 = tpu.matmul %36, %37, %cst_29 {dimension_numbers = #tpu.dot_dimension_numbers<[1], [0], [0], [1], [0, 0, 1, 1], [], []>} : vector<16x128xbf16>, vector<128x512xbf16>, vector<16x512xf32> -> vector<16x512xf32>
      %39 = arith.addf %34, %38 : vector<16x512xf32>
      %c0_30 = arith.constant 0 : index
      %c0_31 = arith.constant 0 : index
      %40 = vector.load %arg6[%c0_30, %c0_31] : memref<1x512xf32, #tpu.memory_space<vmem>>, vector<1x512xf32>
      %41 = vector.broadcast %40 : vector<1x512xf32> to vector<16x512xf32>
      %42 = arith.addf %39, %41 : vector<16x512xf32>
      %43 = vector.extract_strided_slice %42 {offsets = [0, 0], sizes = [16, 128], strides = [1, 1]} : vector<16x512xf32> to vector<16x128xf32>
      %44 = arith.negf %43 : vector<16x128xf32>
      %45 = math.exp %44 : vector<16x128xf32>
      %cst_32 = arith.constant 1.000000e+00 : f32
      %46 = vector.broadcast %cst_32 : f32 to vector<16x128xf32>
      %47 = arith.addf %46, %45 : vector<16x128xf32>
      %48 = arith.divf %46, %47 : vector<16x128xf32>
      %49 = vector.extract_strided_slice %42 {offsets = [0, 128], sizes = [16, 128], strides = [1, 1]} : vector<16x512xf32> to vector<16x128xf32>
      %50 = arith.negf %49 : vector<16x128xf32>
      %51 = math.exp %50 : vector<16x128xf32>
      %cst_33 = arith.constant 1.000000e+00 : f32
      %52 = vector.broadcast %cst_33 : f32 to vector<16x128xf32>
      %53 = arith.addf %52, %51 : vector<16x128xf32>
      %54 = arith.divf %52, %53 : vector<16x128xf32>
      %55 = vector.extract_strided_slice %42 {offsets = [0, 256], sizes = [16, 128], strides = [1, 1]} : vector<16x512xf32> to vector<16x128xf32>
      %56 = math.tanh %55 : vector<16x128xf32>
      %57 = vector.extract_strided_slice %42 {offsets = [0, 384], sizes = [16, 128], strides = [1, 1]} : vector<16x512xf32> to vector<16x128xf32>
      %58 = arith.negf %57 : vector<16x128xf32>
      %59 = math.exp %58 : vector<16x128xf32>
      %cst_34 = arith.constant 1.000000e+00 : f32
      %60 = vector.broadcast %cst_34 : f32 to vector<16x128xf32>
      %61 = arith.addf %60, %59 : vector<16x128xf32>
      %62 = arith.divf %60, %61 : vector<16x128xf32>
      %c0_35 = arith.constant 0 : index
      %c0_36 = arith.constant 0 : index
      %63 = vector.load %arg3[%c0_35, %c0_36] : memref<16x128xf32, #tpu.memory_space<vmem>>, vector<16x128xf32>
      %64 = arith.mulf %54, %63 : vector<16x128xf32>
      %65 = arith.mulf %48, %56 : vector<16x128xf32>
      %66 = arith.addf %64, %65 : vector<16x128xf32>
      %67 = math.tanh %66 : vector<16x128xf32>
      %68 = arith.mulf %62, %67 : vector<16x128xf32>
      %c0_37 = arith.constant 0 : index
      %c0_38 = arith.constant 0 : index
      %69 = vector.load %arg10[%c0_37, %c0_38] : memref<16x128xf32, #tpu.memory_space<vmem>>, vector<16x128xf32>
      tpu.vector_store %arg10[%c0_37, %c0_38], %68 {strides = array<i32>} : memref<16x128xf32, #tpu.memory_space<vmem>>, vector<16x128xf32>,
      %c0_39 = arith.constant 0 : index
      %c0_40 = arith.constant 0 : index
      %70 = vector.load %arg11[%c0_39, %c0_40] : memref<16x128xf32, #tpu.memory_space<vmem>>, vector<16x128xf32>
      tpu.vector_store %arg11[%c0_39, %c0_40], %66 {strides = array<i32>} : memref<16x128xf32, #tpu.memory_space<vmem>>, vector<16x128xf32>,
      %71 = arith.truncf %68 : vector<16x128xf32> to vector<16x128xbf16>
      %c0_41 = arith.constant 0 : index
      %c0_42 = arith.constant 0 : index
      %72 = vector.load %arg12[%c0_41, %c0_42] : memref<16x128xbf16, #tpu.memory_space<vmem>>, vector<16x128xbf16>
      tpu.vector_store %arg12[%c0_41, %c0_42], %71 {strides = array<i32>} : memref<16x128xbf16, #tpu.memory_space<vmem>>, vector<16x128xbf16>,
      %cst_43 = arith.constant 0xFF800000 : f32
      %73 = vector.broadcast %cst_43 : f32 to vector<16x1xf32>
      %c0_44 = arith.constant 0 : index
      %c0_45 = arith.constant 0 : index
      %74 = vector.load %arg13[%c0_44, %c0_45] : memref<16x1xf32, #tpu.memory_space<vmem>>, vector<16x1xf32>
      tpu.vector_store %arg13[%c0_44, %c0_45], %73 {strides = array<i32>} : memref<16x1xf32, #tpu.memory_space<vmem>>, vector<16x1xf32>,
      %cst_46 = arith.constant 0.000000e+00 : f32
      %75 = vector.broadcast %cst_46 : f32 to vector<16x1xf32>
      %c0_47 = arith.constant 0 : index
      %c0_48 = arith.constant 0 : index
      %76 = vector.load %arg14[%c0_47, %c0_48] : memref<16x1xf32, #tpu.memory_space<vmem>>, vector<16x1xf32>
      tpu.vector_store %arg14[%c0_47, %c0_48], %75 {strides = array<i32>} : memref<16x1xf32, #tpu.memory_space<vmem>>, vector<16x1xf32>,
    } else {
    }
    %c0 = arith.constant 0 : index
    %c0_1 = arith.constant 0 : index
    %3 = vector.load %arg12[%c0, %c0_1] : memref<16x128xbf16, #tpu.memory_space<vmem>>, vector<16x128xbf16>
    %c0_2 = arith.constant 0 : index
    %c0_3 = arith.constant 0 : index
    %4 = vector.load %arg7[%c0_2, %c0_3] : memref<128x128xbf16, #tpu.memory_space<vmem>>, vector<128x128xbf16>
    %cst = arith.constant dense<0.000000e+00> : vector<16x128xf32>
    %5 = tpu.matmul %3, %4, %cst {dimension_numbers = #tpu.dot_dimension_numbers<[1], [0], [0], [1], [0, 0, 1, 1], [], []>} : vector<16x128xbf16>, vector<128x128xbf16>, vector<16x128xf32> -> vector<16x128xf32>
    %c0_4 = arith.constant 0 : index
    %c0_5 = arith.constant 0 : index
    %6 = vector.load %arg8[%c0_4, %c0_5] : memref<1x128xf32, #tpu.memory_space<vmem>>, vector<1x128xf32>
    %7 = vector.broadcast %6 : vector<1x128xf32> to vector<16x128xf32>
    %8 = arith.addf %5, %7 : vector<16x128xf32>
    %c0_6 = arith.constant 0 : index
    %c0_7 = arith.constant 0 : index
    %9 = vector.load %arg13[%c0_6, %c0_7] : memref<16x1xf32, #tpu.memory_space<vmem>>, vector<16x1xf32>
    %cst_8 = arith.constant dense<0xFF800000> : vector<16xf32>
    %10 = vector.multi_reduction <maximumf>, %8, %cst_8 [1] : vector<16x128xf32> to vector<16xf32>
    %11 = vector.shape_cast %10 : vector<16xf32> to vector<16x1xf32>
    %12 = arith.maximumf %9, %11 : vector<16x1xf32>
    %c0_9 = arith.constant 0 : index
    %c0_10 = arith.constant 0 : index
    %13 = vector.load %arg14[%c0_9, %c0_10] : memref<16x1xf32, #tpu.memory_space<vmem>>, vector<16x1xf32>
    %14 = arith.subf %9, %12 : vector<16x1xf32>
    %15 = math.exp %14 : vector<16x1xf32>
    %16 = arith.mulf %13, %15 : vector<16x1xf32>
    %17 = vector.broadcast %12 : vector<16x1xf32> to vector<16x128xf32>
    %18 = arith.subf %8, %17 : vector<16x128xf32>
    %19 = math.exp %18 : vector<16x128xf32>
    %cst_11 = arith.constant dense<0.000000e+00> : vector<16xf32>
    %20 = vector.multi_reduction <add>, %19, %cst_11 [1] : vector<16x128xf32> to vector<16xf32>
    %21 = vector.shape_cast %20 : vector<16xf32> to vector<16x1xf32>
    %22 = arith.addf %16, %21 : vector<16x1xf32>
    %c0_12 = arith.constant 0 : index
    %c0_13 = arith.constant 0 : index
    %23 = vector.load %arg14[%c0_12, %c0_13] : memref<16x1xf32, #tpu.memory_space<vmem>>, vector<16x1xf32>
    tpu.vector_store %arg14[%c0_12, %c0_13], %22 {strides = array<i32>} : memref<16x1xf32, #tpu.memory_space<vmem>>, vector<16x1xf32>,
    %c0_14 = arith.constant 0 : index
    %c0_15 = arith.constant 0 : index
    %24 = vector.load %arg13[%c0_14, %c0_15] : memref<16x1xf32, #tpu.memory_space<vmem>>, vector<16x1xf32>
    tpu.vector_store %arg13[%c0_14, %c0_15], %12 {strides = array<i32>} : memref<16x1xf32, #tpu.memory_space<vmem>>, vector<16x1xf32>,
    %25 = arith.index_cast %arg0 : i32 to index
    %c0_16 = arith.constant 0 : index
    %c0_17 = arith.constant 0 : index
    %26 = vector.load %arg9[%25, %c0_16, %c0_17] : memref<1x16x128xf32, #tpu.memory_space<vmem>>, vector<1x16x128xf32>
    %27 = vector.shape_cast %26 : vector<1x16x128xf32> to vector<16x128xf32>
    %28 = vector.shape_cast %8 : vector<16x128xf32> to vector<1x16x128xf32>
    tpu.vector_store %arg9[%25, %c0_16, %c0_17], %28 {strides = array<i32>} : memref<1x16x128xf32, #tpu.memory_space<vmem>>, vector<1x16x128xf32>,
    %c0_i32_18 = arith.constant 0 : i32
    %29 = arith.cmpi eq, %arg0, %c0_i32_18 : i32
    %30 = arith.extui %29 : i1 to i32
    %c0_i32_19 = arith.constant 0 : i32
    %31 = arith.cmpi ne, %30, %c0_i32_19 : i32
    scf.if %31 {
      %c0_20 = arith.constant 0 : index
      %c0_21 = arith.constant 0 : index
      %32 = vector.load %arg13[%c0_20, %c0_21] : memref<16x1xf32, #tpu.memory_space<vmem>>, vector<16x1xf32>
      %c0_22 = arith.constant 0 : index
      %c0_23 = arith.constant 0 : index
      %33 = vector.load %arg14[%c0_22, %c0_23] : memref<16x1xf32, #tpu.memory_space<vmem>>, vector<16x1xf32>
      %34 = math.log %33 : vector<16x1xf32>
      %35 = arith.addf %32, %34 : vector<16x1xf32>
      %c0_24 = arith.constant 0 : index
      %c0_25 = arith.constant 0 : index
      %c0_26 = arith.constant 0 : index
      %36 = vector.load %arg9[%c0_24, %c0_25, %c0_26] : memref<1x16x128xf32, #tpu.memory_space<vmem>>, vector<1x16x128xf32>
      %37 = vector.shape_cast %36 : vector<1x16x128xf32> to vector<16x128xf32>
      %38 = vector.broadcast %35 : vector<16x1xf32> to vector<16x128xf32>
      %39 = arith.subf %37, %38 : vector<16x128xf32>
      %c0_27 = arith.constant 0 : index
      %c0_28 = arith.constant 0 : index
      %c0_29 = arith.constant 0 : index
      %40 = vector.load %arg9[%c0_27, %c0_28, %c0_29] : memref<1x16x128xf32, #tpu.memory_space<vmem>>, vector<1x16x128xf32>
      %41 = vector.shape_cast %40 : vector<1x16x128xf32> to vector<16x128xf32>
      %42 = vector.shape_cast %39 : vector<16x128xf32> to vector<1x16x128xf32>
      tpu.vector_store %arg9[%c0_27, %c0_28, %c0_29], %42 {strides = array<i32>} : memref<1x16x128xf32, #tpu.memory_space<vmem>>, vector<1x16x128xf32>,
    } else {
    }
    return
  }
  func.func @transform_0(%arg0: i32) -> (i32, i32) {
    %c0_i32 = arith.constant 0 : i32
    %c0_i32_0 = arith.constant 0 : i32
    %c0_i32_1 = arith.constant 0 : i32
    return %c0_i32, %c0_i32_0 : i32, i32
  }
  func.func @transform_1(%arg0: i32) -> (i32, i32) {
    %c0_i32 = arith.constant 0 : i32
    %c0_i32_0 = arith.constant 0 : i32
    %c0_i32_1 = arith.constant 0 : i32
    return %c0_i32, %c0_i32_0 : i32, i32
  }
  func.func @transform_2(%arg0: i32) -> (i32, i32) {
    %c0_i32 = arith.constant 0 : i32
    %c0_i32_0 = arith.constant 0 : i32
    %c0_i32_1 = arith.constant 0 : i32
    return %c0_i32, %c0_i32_0 : i32, i32
  }
  func.func @transform_3(%arg0: i32) -> (i32, i32) {
    %c0_i32 = arith.constant 0 : i32
    %c0_i32_0 = arith.constant 0 : i32
    %c0_i32_1 = arith.constant 0 : i32
    return %c0_i32, %c0_i32_0 : i32, i32
  }
  func.func @transform_4(%arg0: i32) -> (i32, i32) {
    %c0_i32 = arith.constant 0 : i32
    %c0_i32_0 = arith.constant 0 : i32
    %c0_i32_1 = arith.constant 0 : i32
    return %c0_i32, %c0_i32_0 : i32, i32
  }
  func.func @transform_5(%arg0: i32) -> (i32, i32) {
    %c0_i32 = arith.constant 0 : i32
    %c0_i32_0 = arith.constant 0 : i32
    %c0_i32_1 = arith.constant 0 : i32
    return %c0_i32, %c0_i32_0 : i32, i32
  }
  func.func @transform_6(%arg0: i32) -> (i32, i32) {
    %c0_i32 = arith.constant 0 : i32
    %c0_i32_0 = arith.constant 0 : i32
    return %c0_i32, %arg0 : i32, i32
  }
  func.func @transform_7(%arg0: i32) -> (i32, i32) {
    %c0_i32 = arith.constant 0 : i32
    %c0_i32_0 = arith.constant 0 : i32
    return %c0_i32, %arg0 : i32, i32
  }
  func.func @transform_8(%arg0: i32) -> (i32, i32, i32) {
    %c0_i32 = arith.constant 0 : i32
    %c0_i32_0 = arith.constant 0 : i32
    %c0_i32_1 = arith.constant 0 : i32
    %c0_i32_2 = arith.constant 0 : i32
    return %c0_i32, %c0_i32_0, %c0_i32_1 : i32, i32, i32
  }
  func.func @transform_9(%arg0: i32) -> (i32, i32) {
    %c0_i32 = arith.constant 0 : i32
    %c0_i32_0 = arith.constant 0 : i32
    %c0_i32_1 = arith.constant 0 : i32
    return %c0_i32, %c0_i32_0 : i32, i32
  }
  func.func @transform_10(%arg0: i32) -> (i32, i32) {
    %c0_i32 = arith.constant 0 : i32
    %c0_i32_0 = arith.constant 0 : i32
    %c0_i32_1 = arith.constant 0 : i32
    return %c0_i32, %c0_i32_0 : i32, i32
  }
}

</mosaic_0001>

<bundles_post_ra>
// kernel: tpu_custom_call.1
= control target key start
LH: loop header
LB: loop body
LE: loop exit
PB: predicated region body
PF: predicated region fallthrough
CT: control target
= control target key end

     0   :  { %16 = vsyncpa [#allocation6], 0  ;;  %s1651_s0 = inlined_call_operand.vmem [shape: bf16[16,128], index: 0, kind: input, shape index: {}]   ;;  %s1652_s1 = inlined_call_operand.hbm [shape: f32[16,128], index: 1, kind: input, shape index: {}, may-alias: {1,9}]   ;;  %s1653_s2 = inlined_call_operand.hbm [shape: f32[16,128], index: 2, kind: input, shape index: {}, may-alias: {2,10}]   ;;  %s1654_s3 = inlined_call_operand.hbm [shape: bf16[128,512], index: 3, kind: input, shape index: {}]   ;;  %s1655_s4 = inlined_call_operand.hbm [shape: bf16[128,512], index: 4, kind: input, shape index: {}]   ;;  %s1656_s5 = inlined_call_operand.hbm [shape: f32[1,512], index: 5, kind: input, shape index: {}]   ;;  %s1657_s6 = inlined_call_operand.vmem [shape: bf16[128,128], index: 6, kind: input, shape index: {}]   ;;  %s1658_s7 = inlined_call_operand.vmem [shape: f32[1,128], index: 7, kind: input, shape index: {}]   ;;  %s1659_s8 = inlined_call_operand.hbm [shape: f32[1,16,128], index: 8, kind: output, shape index: {0}]   ;;  %s1660_s9 = inlined_call_operand.hbm [shape: f32[16,128], index: 9, kind: output, shape index: {1}, may-alias: {1,9}]   ;;  %s1661_s10 = inlined_call_operand.hbm [shape: f32[16,128], index: 10, kind: output, shape index: {2}, may-alias: {2,10}]  }
   0x1   :  { %17 = vsyncpa [#allocation9], 0 }
   0x2   :  { %18 = vsyncpa [#allocation12], 0 }
   0x3   :  { %19 = vsyncpa [#allocation7], 0 }
   0x4   :  { %20 = vsyncpa [#allocation16], 0  ;;  %s1476_s13 = smov [#allocation8]  }
   0x5   :  { %s40_s14 = sshll.u32 %s1476_s13, 4  ;;  %s41_s14 = int_to_ptr.vmem [resolvable:$true] %s40_s14 }
   0x6   :  { %s1314_s15 = scalar_lea.vmem %s41_s14, 256  ;;  %p1319_p1 = scmp.lt.s32.totalorder %s41_s14, %s41_s14 }
   0x7   :  { %p1315_p0 = scmp.ne.s32.totalorder %s41_s14, %s1314_s15  ;;  %p1320_p2 = scmp.lt.s32.totalorder %s1314_s15, %s1314_s15 }
   0x9   :  { %p1321_p3 = por %p1320_p2, %p1319_p1 }
   0xb   :  { %p1322_p4 = pnand %p1321_p3, %p1315_p0 }
   0xd   :  { %1325 = shalt.err (!%p1322_p4)
}
   0xe   :  { %s1477_s16 = smov 128   ;;  %s1478_s17 = smov 8  }
   0xf   :  { %46 = dma.hbm_to_vmem [thread:$0]  %s1653_s2, 256, %s41_s14, [#allocation9], %s1477_s16, %s1477_s16, %s1478_s17  }
  0x10   :  { %s1479_s20 = smov [#allocation11]   ;;  %s1480_s22 = smov [#allocation5]  }
  0x11   :  { %s64_s21 = sshll.u32 %s1479_s20, 4  ;;  %s28_s23 = sshll.u32 %s1480_s22, 4  ;;  %s65_s21 = int_to_ptr.vmem [resolvable:$true] %s64_s21  ;;  %s29_s23 = int_to_ptr.vmem [resolvable:$true] %s28_s23 }
  0x12   :  { %s1334_s24 = scalar_lea.vmem %s65_s21, 4096  ;;  %p1339_p6 = scmp.lt.s32.totalorder %s65_s21, %s65_s21 }
  0x13   :  { %p1335_p5 = scmp.ne.s32.totalorder %s65_s21, %s1334_s24  ;;  %p1340_p7 = scmp.lt.s32.totalorder %s1334_s24, %s1334_s24 }
  0x15   :  { %p1341_p8 = por %p1340_p7, %p1339_p6 }
  0x17   :  { %p1342_p9 = pnand %p1341_p8, %p1335_p5 }
  0x19   :  { %1345 = shalt.err (!%p1342_p9)
}
  0x1a   :  { %s1481_s25 = smov 256   ;;  %s1482_s26 = smov 16  }
  0x1b   :  { %70 = dma.hbm_to_vmem [thread:$0]  %s1655_s4, 4096, %s65_s21, [#allocation12], %s1481_s25, %s1481_s25, %s1482_s26  }
  0x1c   :  { %s1354_s2 = scalar_lea.vmem %s29_s23, 256  ;;  %p1359_p11 = scmp.lt.s32.totalorder %s29_s23, %s29_s23 }
  0x1d   :  { %p1355_p10 = scmp.ne.s32.totalorder %s29_s23, %s1354_s2  ;;  %p1360_p12 = scmp.lt.s32.totalorder %s1354_s2, %s1354_s2 }
  0x1f   :  { %p1361_p13 = por %p1360_p12, %p1359_p11 }
  0x21   :  { %p1362_p0 = pnand %p1361_p13, %p1355_p10 }
  0x23   :  { %1365 = shalt.err (!%p1362_p0)
}
  0x24   :  { %34 = dma.hbm_to_vmem [thread:$0]  %s1652_s1, 256, %s29_s23, [#allocation6], %s1477_s16, %s1477_s16, %s1478_s17  }
  0x25   :  { %s1483_s11 = smov [#allocation10]   ;;  %s1484_s13 = smov [#allocation13]  }
  0x26   :  { %s52_s12 = sshll.u32 %s1483_s11, 4  ;;  %s77_s4 = sshll.u32 %s1484_s13, 4  ;;  %s53_s12 = int_to_ptr.vmem [resolvable:$true] %s52_s12  ;;  %s78_s4 = int_to_ptr.vmem [resolvable:$true] %s77_s4 }
  0x27   :  { %s1374_s14 = scalar_lea.vmem %s53_s12, 4096  ;;  %p1379_p2 = scmp.lt.s32.totalorder %s53_s12, %s53_s12 }
  0x28   :  { %p1375_p1 = scmp.ne.s32.totalorder %s53_s12, %s1374_s14  ;;  %p1380_p3 = scmp.lt.s32.totalorder %s1374_s14, %s1374_s14 }
  0x2a   :  { %p1381_p4 = por %p1380_p3, %p1379_p2 }
  0x2c   :  { %p1382_p5 = pnand %p1381_p4, %p1375_p1 }
  0x2e   :  { %1385 = shalt.err (!%p1382_p5)
}
  0x2f   :  { %58 = dma.hbm_to_vmem [thread:$0]  %s1654_s3, 4096, %s53_s12, [#allocation9], %s1481_s25, %s1481_s25, %s1482_s26  }
  0x30   :  { %s1394_s19 = scalar_lea.vmem %s78_s4, 64  ;;  %p1399_p7 = scmp.lt.s32.totalorder %s78_s4, %s78_s4 }
  0x31   :  { %p1395_p6 = scmp.ne.s32.totalorder %s78_s4, %s1394_s19  ;;  %p1400_p8 = scmp.lt.s32.totalorder %s1394_s19, %s1394_s19 }
  0x33   :  { %p1401_p9 = por %p1400_p8, %p1399_p7 }
  0x35   :  { %p1402_p10 = pnand %p1401_p9, %p1395_p6 }
  0x37   :  { %1405 = shalt.err (!%p1402_p10)
}
  0x38   :  { %80 = dma.hbm_to_vmem [thread:$0]  %s1656_s5, 64, %s78_s4, [#allocation12]  }
  0x39   :  { %1466 = dma.done.wait [#allocation6], 256  }
  0x3a   :  { %1467 = vsyncadd [#allocation6], 4294967040 }
  0x3b   :  { %1468 = dma.done.wait [#allocation9], 4352  }
  0x3c   :  { %1469 = vsyncadd [#allocation9], 4294962944 }
  0x3d   :  { %1470 = dma.done.wait [#allocation12], 4160  }
  0x3e   :  { %1471 = vsyncadd [#allocation12], 4294963136  ;;  %v1485_v0 = vmov 0   ;;  %v1156_v1 = vld [vmem:[#allocation11 + $0xe4] ss:$16 sps:$4 sm:$0xff]   ;;  %v140_v34 = vld [vmem:[#allocation5 + $0x8] sm:$0xff] }
  0x3f   :  { %366 = vmatprep.mubr.bf16.mxu0 %v1485_v0  ;;  %409 = vmatprep.mubr.bf16.mxu1 %v1485_v0  ;;  %v1158_v2 = vld [vmem:[#allocation11 + $0xec] ss:$16 sps:$4 sm:$0xff]   ;;  %v1160_v3 = vld [vmem:[#allocation11 + $0xe0] ss:$16 sps:$4 sm:$0xff]   ;;  %v1161_v4 = vld [vmem:[#allocation11 + $0xe8] ss:$16 sps:$4 sm:$0xff]  }
  0x40   :  { %1154 = vset.pattern.permute.xlu1 %v1485_v0  ;;  %1155 = vset.pattern.permute.xlu0 %v1485_v0  ;;  %v1162_v5 = vld [vmem:[#allocation11 + $0xc4] ss:$16 sps:$4 sm:$0xff]   ;;  %v1164_v6 = vld [vmem:[#allocation11 + $0xcc] ss:$16 sps:$4 sm:$0xff]   ;;  %v1166_v7 = vld [vmem:[#allocation11 + $0xc0] ss:$16 sps:$4 sm:$0xff]  }
  0x41   :  { %334 = vmatprep.subr.bf16.mxu0 %v1156_v1  ;;  %377 = vmatprep.subr.bf16.mxu1 %v1158_v2  ;;  %v1167_v8 = vld [vmem:[#allocation11 + $0xc8] ss:$16 sps:$4 sm:$0xff]   ;;  %v1168_v9 = vld [vmem:[#allocation11 + $0xa4] ss:$16 sps:$4 sm:$0xff]   ;;  %v1170_v10 = vld [vmem:[#allocation11 + $0xac] ss:$16 sps:$4 sm:$0xff]  }
  0x42   :  { %335 = vmatpush1.bf16.msra.mxu0 %v1160_v3  ;;  %378 = vmatpush1.bf16.msra.mxu1 %v1161_v4  ;;  %v1172_v11 = vld [vmem:[#allocation11 + $0xa0] ss:$16 sps:$4 sm:$0xff]   ;;  %v1173_v12 = vld [vmem:[#allocation11 + $0xa8] ss:$16 sps:$4 sm:$0xff]   ;;  %v1174_v13 = vld [vmem:[#allocation11 + $0x84] ss:$16 sps:$4 sm:$0xff]  }
  0x43   :  { %336 = vmatprep.subr.bf16.mxu0 %v1162_v5  ;;  %379 = vmatprep.subr.bf16.mxu1 %v1164_v6  ;;  %v1176_v14 = vld [vmem:[#allocation11 + $0x8c] ss:$16 sps:$4 sm:$0xff]   ;;  %v1178_v15 = vld [vmem:[#allocation11 + $0x80] ss:$16 sps:$4 sm:$0xff]   ;;  %v1179_v16 = vld [vmem:[#allocation11 + $0x88] ss:$16 sps:$4 sm:$0xff]  }
  0x44   :  { %v1180_v17 = vld [vmem:[#allocation11 + $0x64] ss:$16 sps:$4 sm:$0xff]   ;;  %v1182_v18 = vld [vmem:[#allocation11 + $0x6c] ss:$16 sps:$4 sm:$0xff]   ;;  %v1184_v19 = vld [vmem:[#allocation11 + $0x60] ss:$16 sps:$4 sm:$0xff]  }
  0x45   :  { %v1185_v20 = vld [vmem:[#allocation11 + $0x68] ss:$16 sps:$4 sm:$0xff]   ;;  %v1186_v21 = vld [vmem:[#allocation11 + $0x44] ss:$16 sps:$4 sm:$0xff]   ;;  %v1188_v22 = vld [vmem:[#allocation11 + $0x4c] ss:$16 sps:$4 sm:$0xff]  }
  0x46   :  { %337 = vmatpush1.bf16.msra.mxu0 %v1166_v7  ;;  %380 = vmatpush1.bf16.msra.mxu1 %v1167_v8  ;;  %v1190_v23 = vld [vmem:[#allocation11 + $0x40] ss:$16 sps:$4 sm:$0xff]   ;;  %v1191_v24 = vld [vmem:[#allocation11 + $0x48] ss:$16 sps:$4 sm:$0xff]   ;;  %v1192_v25 = vld [vmem:[#allocation11 + $0x24] ss:$16 sps:$4 sm:$0xff]  }
  0x47   :  { %338 = vmatprep.subr.bf16.mxu0 %v1168_v9  ;;  %381 = vmatprep.subr.bf16.mxu1 %v1170_v10  ;;  %v1194_v26 = vld [vmem:[#allocation11 + $0x2c] ss:$16 sps:$4 sm:$0xff]   ;;  %v1196_v27 = vld [vmem:[#allocation11 + $0x20] ss:$16 sps:$4 sm:$0xff]   ;;  %v1197_v28 = vld [vmem:[#allocation11 + $0x28] ss:$16 sps:$4 sm:$0xff]  }
  0x48   :  { %v1198_v29 = vld [vmem:[#allocation11 + $0x4] ss:$16 sps:$4 sm:$0xff]   ;;  %v1200_v30 = vld [vmem:[#allocation11 + $0xc] ss:$16 sps:$4 sm:$0xff]   ;;  %v1202_v31 = vld [vmem:[#allocation11] ss:$16 sps:$4 sm:$0xff]  }
  0x49   :  { %v1203_v32 = vld [vmem:[#allocation11 + $0x8] ss:$16 sps:$4 sm:$0xff]   ;;  %v139_v33 = vld [vmem:[#allocation5] sm:$0xff]  ;;  %v1209_v36 = vld [vmem:[#allocation10 + $0xec] ss:$16 sps:$4 sm:$0xff]   ;;  %v1486_v6 = vmov 0.0  }
  0x4a   :  { %339 = vmatpush1.bf16.msra.mxu0 %v1172_v11  ;;  %382 = vmatpush1.bf16.msra.mxu1 %v1173_v12  ;;  %v1206_v35 = vld [vmem:[#allocation10 + $0xe4] ss:$16 sps:$4 sm:$0xff]   ;;  %v141_v37 = vpack.c.bf16 %v140_v34, %v139_v33  ;;  %v1204_v38 = vld [vmem:[#allocation10 + $0xe0] ss:$16 sps:$4 sm:$0xff]   ;;  %v1207_v39 = vld [vmem:[#allocation10 + $0xe8] ss:$16 sps:$4 sm:$0xff]  }
  0x4b   :  { %340 = vmatprep.subr.bf16.mxu0 %v1174_v13  ;;  %383 = vmatprep.subr.bf16.mxu1 %v1176_v14  ;;  %v1212_v40 = vld [vmem:[#allocation10 + $0xc4] ss:$16 sps:$4 sm:$0xff]   ;;  %v1215_v41 = vld [vmem:[#allocation10 + $0xcc] ss:$16 sps:$4 sm:$0xff]   ;;  %v1210_v42 = vld [vmem:[#allocation10 + $0xc0] ss:$16 sps:$4 sm:$0xff]  }
  0x4c   :  { %v1213_v43 = vld [vmem:[#allocation10 + $0xc8] ss:$16 sps:$4 sm:$0xff]   ;;  %v1218_v44 = vld [vmem:[#allocation10 + $0xa4] ss:$16 sps:$4 sm:$0xff]   ;;  %v1221_v45 = vld [vmem:[#allocation10 + $0xac] ss:$16 sps:$4 sm:$0xff]  }
  0x4d   :  { %v1216_v46 = vld [vmem:[#allocation10 + $0xa0] ss:$16 sps:$4 sm:$0xff]   ;;  %v1219_v47 = vld [vmem:[#allocation10 + $0xa8] ss:$16 sps:$4 sm:$0xff]   ;;  %v1224_v48 = vld [vmem:[#allocation10 + $0x84] ss:$16 sps:$4 sm:$0xff]  }
  0x4e   :  { %341 = vmatpush1.bf16.msra.mxu0 %v1178_v15  ;;  %384 = vmatpush1.bf16.msra.mxu1 %v1179_v16  ;;  %v1227_v49 = vld [vmem:[#allocation10 + $0x8c] ss:$16 sps:$4 sm:$0xff]   ;;  %v1222_v50 = vld [vmem:[#allocation10 + $0x80] ss:$16 sps:$4 sm:$0xff]   ;;  %v1225_v51 = vld [vmem:[#allocation10 + $0x88] ss:$16 sps:$4 sm:$0xff]   ;;  %v674_v16 = vlaneseq }
  0x4f   :  { %342 = vmatprep.subr.bf16.mxu0 %v1180_v17  ;;  %385 = vmatprep.subr.bf16.mxu1 %v1182_v18  ;;  %v1230_v52 = vld [vmem:[#allocation10 + $0x64] ss:$16 sps:$4 sm:$0xff]   ;;  %v1233_v53 = vld [vmem:[#allocation10 + $0x6c] ss:$16 sps:$4 sm:$0xff]   ;;  %v1228_v54 = vld [vmem:[#allocation10 + $0x60] ss:$16 sps:$4 sm:$0xff]  }
  0x50   :  { %v1231_v55 = vld [vmem:[#allocation10 + $0x68] ss:$16 sps:$4 sm:$0xff]   ;;  %v1236_v56 = vld [vmem:[#allocation10 + $0x44] ss:$16 sps:$4 sm:$0xff]   ;;  %v1239_v57 = vld [vmem:[#allocation10 + $0x4c] ss:$16 sps:$4 sm:$0xff]  }
  0x51   :  { %v1234_v58 = vld [vmem:[#allocation10 + $0x40] ss:$16 sps:$4 sm:$0xff]   ;;  %v1237_v59 = vld [vmem:[#allocation10 + $0x48] ss:$16 sps:$4 sm:$0xff]   ;;  %v1242_v60 = vld [vmem:[#allocation10 + $0x24] ss:$16 sps:$4 sm:$0xff]  }
  0x52   :  { %343 = vmatpush1.bf16.msra.mxu0 %v1184_v19  ;;  %386 = vmatpush1.bf16.msra.mxu1 %v1185_v20  ;;  %v1245_v61 = vld [vmem:[#allocation10 + $0x2c] ss:$16 sps:$4 sm:$0xff]   ;;  %v1240_v62 = vld [vmem:[#allocation10 + $0x20] ss:$16 sps:$4 sm:$0xff]   ;;  %v1243_v63 = vld [vmem:[#allocation10 + $0x28] ss:$16 sps:$4 sm:$0xff]  }
  0x53   :  { %344 = vmatprep.subr.bf16.mxu0 %v1186_v21  ;;  %387 = vmatprep.subr.bf16.mxu1 %v1188_v22  ;;  %v1251_v1 = vld [vmem:[#allocation10 + $0xc] ss:$16 sps:$4 sm:$0xff]   ;;  %v1246_v2 = vld [vmem:[#allocation10] ss:$16 sps:$4 sm:$0xff]   ;;  %v1249_v3 = vld [vmem:[#allocation10 + $0x8] ss:$16 sps:$4 sm:$0xff]  }
  0x54   :  { %v1252_v4 = vld [vmem:[%s1651_s0] sm:$0xff]   ;;  %v1253_v5 = vld [vmem:[%s1657_s6 + $0x38] sm:$0xff]   ;;  %v1254_v7 = vld [vmem:[%s1657_s6 + $0x30] sm:$0xff]   ;;  %vm1487_vm0 = vmmov 0   ;;  %v675_v19 = vshrl.u32 %v674_v16, 7  ;;  %vm766_vm1 = vcmask 7168  }
  0x55   :  { %v1255_v8 = vld [vmem:[%s1657_s6 + $0x28] sm:$0xff]   ;;  %v1256_v9 = vld [vmem:[%s1657_s6 + $0x20] sm:$0xff]   ;;  %v1257_v10 = vld [vmem:[%s1657_s6 + $0x18] sm:$0xff]   ;;  %769 = vst.msk [vmem:[#allocation4] sm:$0xff] %vm766_vm1, %v1486_v6 }
  0x56   :  { %345 = vmatpush1.bf16.msra.mxu0 %v1190_v23  ;;  %388 = vmatpush1.bf16.msra.mxu1 %v1191_v24  ;;  %v1258_v11 = vld [vmem:[%s1657_s6 + $0x10] sm:$0xff]   ;;  %v1259_v12 = vld [vmem:[%s1657_s6 + $0x8] sm:$0xff]   ;;  %v1260_v13 = vld [vmem:[%s1657_s6] sm:$0xff]   ;;  %v676_v22 = vsub.s32 0, %v675_v19  ;;  %v680_v24 = vsub.s32 1, %v675_v19  ;;  %770 = vst.msk [vmem:[#allocation4 + $0x8] sm:$0xff] %vm766_vm1, %v1486_v6 }
  0x57   :  { %346 = vmatprep.subr.bf16.mxu0 %v1192_v25  ;;  %389 = vmatprep.subr.bf16.mxu1 %v1194_v26  ;;  %v672_v23 = vld [vmem:[#allocation13] sm:$0xf] }
  0x5a   :  { %347 = vmatpush1.bf16.msra.mxu0 %v1196_v27  ;;  %390 = vmatpush1.bf16.msra.mxu1 %v1197_v28  ;;  %v677_v27 = vrot.slane %v672_v23, %v676_v22 }
  0x5b   :  { %348 = vmatprep.subr.bf16.mxu0 %v1198_v29  ;;  %391 = vmatprep.subr.bf16.mxu1 %v1200_v30 }
  0x5e   :  { %349 = vmatpush1.bf16.msra.mxu0 %v1202_v31  ;;  %392 = vmatpush1.bf16.msra.mxu1 %v1203_v32  ;;  %v681_v31 = vrot.slane %v672_v23, %v680_v24 }
  0x5f   :  { %586 = vmatprep.subr.bf16.mxu0 %v1206_v35  ;;  %629 = vmatprep.subr.bf16.mxu1 %v1209_v36 }
  0x61   :  { %367 = vmatmul.mubr.bf16.vlgmr.msra.gmra.mxu0 %v141_v37  ;;  %410 = vmatmul.mubr.bf16.vlgmr.msra.gmra.mxu1 %v141_v37 }
  0x62   :  { %587 = vmatpush1.bf16.msra.mxu0 %v1204_v38  ;;  %630 = vmatpush1.bf16.msra.mxu1 %v1207_v39  ;;  %v688_v39 = vsub.s32 3, %v675_v19 }
  0x63   :  { %588 = vmatprep.subr.bf16.mxu0 %v1212_v40  ;;  %631 = vmatprep.subr.bf16.mxu1 %v1215_v41 }
  0x64   :  { %618 = vmatprep.mubr.bf16.mxu0 %v1485_v0  ;;  %661 = vmatprep.mubr.bf16.mxu1 %v1485_v0  ;;  %v1248_v0 = vld [vmem:[#allocation10 + $0x4] ss:$16 sps:$4 sm:$0xff]  }
  0x66   :  { %589 = vmatpush1.bf16.msra.mxu0 %v1210_v42  ;;  %632 = vmatpush1.bf16.msra.mxu1 %v1213_v43 }
  0x67   :  { %590 = vmatprep.subr.bf16.mxu0 %v1218_v44  ;;  %633 = vmatprep.subr.bf16.mxu1 %v1221_v45 }
  0x6a   :  { %591 = vmatpush1.bf16.msra.mxu0 %v1216_v46  ;;  %634 = vmatpush1.bf16.msra.mxu1 %v1219_v47 }
  0x6b   :  { %592 = vmatprep.subr.bf16.mxu0 %v1224_v48  ;;  %635 = vmatprep.subr.bf16.mxu1 %v1227_v49  ;;  %v689_v48 = vrot.slane %v672_v23, %v688_v39 }
  0x6e   :  { %593 = vmatpush1.bf16.msra.mxu0 %v1222_v50  ;;  %636 = vmatpush1.bf16.msra.mxu1 %v1225_v51 }
  0x6f   :  { %594 = vmatprep.subr.bf16.mxu0 %v1230_v52  ;;  %637 = vmatprep.subr.bf16.mxu1 %v1233_v53  ;;  %v684_v52 = vsub.s32 2, %v675_v19 }
  0x72   :  { %595 = vmatpush1.bf16.msra.mxu0 %v1228_v54  ;;  %638 = vmatpush1.bf16.msra.mxu1 %v1231_v55 }
  0x73   :  { %596 = vmatprep.subr.bf16.mxu0 %v1236_v56  ;;  %639 = vmatprep.subr.bf16.mxu1 %v1239_v57  ;;  %v685_v56 = vrot.slane %v672_v23, %v684_v52 }
  0x76   :  { %597 = vmatpush1.bf16.msra.mxu0 %v1234_v58  ;;  %640 = vmatpush1.bf16.msra.mxu1 %v1237_v59 }
  0x77   :  { %598 = vmatprep.subr.bf16.mxu0 %v1242_v60  ;;  %641 = vmatprep.subr.bf16.mxu1 %v1245_v61 }
  0x7a   :  { %599 = vmatpush1.bf16.msra.mxu0 %v1240_v62  ;;  %642 = vmatpush1.bf16.msra.mxu1 %v1243_v63 }
  0x7b   :  { %600 = vmatprep.subr.bf16.mxu0 %v1248_v0  ;;  %643 = vmatprep.subr.bf16.mxu1 %v1251_v1 }
  0x7e   :  { %601 = vmatpush1.bf16.msra.mxu0 %v1246_v2  ;;  %644 = vmatpush1.bf16.msra.mxu1 %v1249_v3 }
  0x7f   :  { %1118 = vmatprep.subr.bf16.mxu0 %v1486_v6 }
  0x81   :  { %619 = vmatmul.mubr.bf16.vlgmr.msra.gmra.mxu0 %v1252_v4  ;;  %662 = vmatmul.mubr.bf16.vlgmr.msra.gmra.mxu1 %v1252_v4 }
  0x82   :  { %1119 = vmatpush3.bf16.msra.mxu0 %v1253_v5  ;;  %1134 = vmatprep.mubr.msk.bf16.mxu0 %vm1487_vm0, %v1486_v6 }
  0x83   :  { %1120 = vmatprep.subr.bf16.mxu0 %v1486_v6 }
  0x86   :  { %1121 = vmatpush3.bf16.msra.mxu0 %v1254_v7 }
  0x87   :  { %1122 = vmatprep.subr.bf16.mxu0 %v1486_v6 }
  0x8a   :  { %1123 = vmatpush3.bf16.msra.mxu0 %v1255_v8 }
  0x8b   :  { %1124 = vmatprep.subr.bf16.mxu0 %v1486_v6 }
  0x8e   :  { %1125 = vmatpush3.bf16.msra.mxu0 %v1256_v9 }
  0x8f   :  { %1126 = vmatprep.subr.bf16.mxu0 %v1486_v6 }
  0x92   :  { %1127 = vmatpush3.bf16.msra.mxu0 %v1257_v10  ;;  %v740_v10 = vld [vmem:[#allocation8] sm:$0xff] }
  0x93   :  { %1128 = vmatprep.subr.bf16.mxu0 %v1486_v6 }
  0x96   :  { %1129 = vmatpush3.bf16.msra.mxu0 %v1258_v11 }
  0x97   :  { %1130 = vmatprep.subr.bf16.mxu0 %v1486_v6 }
  0x9a   :  { %1131 = vmatpush3.bf16.msra.mxu0 %v1259_v12 }
  0x9b   :  { %1132 = vmatprep.subr.bf16.mxu0 %v1486_v6 }
  0x9e   :  { %1133 = vmatpush3.bf16.msra.mxu0 %v1260_v13 }
 0x121   :  { %v368_v14 = vpop.f32.mrf.mxu0  ;;  %v411_v15 = vpop.f32.mrf.mxu1 }
 0x123   :  { %v370_v17 = vpop.f32.mrf.mxu0  ;;  %v413_v18 = vpop.f32.mrf.mxu1 }
 0x125   :  { %v372_v20 = vpop.f32.mrf.mxu0  ;;  %v415_v21 = vpop.f32.mrf.mxu1 }
 0x127   :  { %v374_v25 = vpop.f32.mrf.mxu0  ;;  %v417_v26 = vpop.f32.mrf.mxu1 }
 0x141   :  { %v620_v28 = vpop.f32.mrf.mxu0  ;;  %v663_v29 = vpop.f32.mrf.mxu1 }
 0x142   :  { %v621_v30 = vadd.f32 %v620_v28, %v368_v14  ;;  %v664_v55 = vadd.f32 %v663_v29, %v411_v15 }
 0x143   :  { %v622_v32 = vpop.f32.mrf.mxu0  ;;  %v665_v35 = vpop.f32.mrf.mxu1 }
 0x144   :  { %v694_v33 = vadd.f32 %v677_v27, %v621_v30  ;;  %v623_v34 = vadd.f32 %v622_v32, %v370_v17  ;;  %v666_v47 = vadd.f32 %v665_v35, %v413_v18  ;;  %v696_v61 = vadd.f32 %v685_v56, %v664_v55  ;;  %v741_v18 = vld [vmem:[#allocation8 + $0x8] sm:$0xff] }
 0x145   :  { %v624_v36 = vpop.f32.mrf.mxu0  ;;  %v667_v43 = vpop.f32.mrf.mxu1  ;;  %v1092_v35 = vld [vmem:[%s1658_s7] ss:$0 sm:$0xff]  ;;  %s1489_s7 = smov [#allocation15]  }
 0x146   :  { %v1084_v37 = vmul.f32 -1.442695, %v694_v33  ;;  %v695_v38 = vadd.f32 %v681_v31, %v623_v34  ;;  %v625_v40 = vadd.f32 %v624_v36, %v372_v20  ;;  %v697_v53 = vadd.f32 %v689_v48, %v666_v47  ;;  %s986_s15 = sshll.u32 %s1489_s7, 4  ;;  %s987_s15 = int_to_ptr.vmem [resolvable:$true] %s986_s15 }
 0x147   :  { %v626_v41 = vpop.f32.mrf.mxu0  ;;  %v669_v51 = vpop.f32.mrf.mxu1  ;;  %v668_v59 = vadd.f32 %v667_v43, %v415_v21  ;;  %v1488_v34 = vmov -inf   ;;  %s1406_s18 = scalar_lea.vmem %s987_s15, 256  ;;  %p1411_p12 = scmp.lt.s32.totalorder %s987_s15, %s987_s15 }
 0x148   :  { %1262 = vpow2.f32 %v1084_v37  ;;  %v1086_v42 = vmul.f32 -1.442695, %v695_v38  ;;  %v627_v44 = vadd.f32 %v626_v41, %v374_v25  ;;  %v698_v45 = vadd.f32 %v677_v27, %v625_v40  ;;  %767 = vst.msk [vmem:[#allocation3] sm:$0xff] %vm766_vm1, %v1488_v34  ;;  %768 = vst.msk [vmem:[#allocation3 + $0x8] sm:$0xff] %vm766_vm1, %v1488_v34  ;;  %p1407_p11 = scmp.ne.s32.totalorder %s987_s15, %s1406_s18  ;;  %p1412_p13 = scmp.lt.s32.totalorder %s1406_s18, %s1406_s18 }
 0x149   :  { %v670_v54 = vadd.f32 %v669_v51, %v417_v26  ;;  %v1088_v57 = vmul.f32 -1.442695, %v697_v53  ;;  %v700_v2 = vadd.f32 %v685_v56, %v668_v59 }
 0x14a   :  { %1264 = vpow2.f32 %v1086_v42  ;;  %v699_v46 = vadd.f32 %v681_v31, %v627_v44  ;;  %v1085_v49 = vmul.f32 -1.442695, %v698_v45  ;;  %p1413_p0 = por %p1412_p13, %p1411_p12 }
 0x14b   :  { %v701_v58 = vadd.f32 %v689_v48, %v670_v54 }
 0x14c   :  { %v1087_v50 = vmul.f32 -1.442695, %v699_v46  ;;  %1266 = vpow2.f32 %v1085_v49  ;;  %p1414_p1 = pnand %p1413_p0, %p1407_p11 }
 0x14d   :  { %v1089_v0 = vmul.f32 -1.442695, %v701_v58 }
 0x14e   :  { %1268 = vpow2.f32 %v1087_v50 }
 0x14f   :  { %1270 = vpow2.f32 %v1088_v57  ;;  %v891_v42 = vld [vmem:[#allocation3] sm:$0xff]  ;;  %v892_v6 = vld [vmem:[#allocation3 + $0x8] sm:$0xff] }
 0x155   :  { %v1263_v60 = vpop.eup %1262 }
 0x156   :  { %v708_v62 = vadd.f32 1.0, %v1263_v60  ;;  %v899_v60 = vld [vmem:[#allocation4] sm:$0xff] }
 0x157   :  { %v1265_v63 = vpop.eup %1264 }
 0x158   :  { %1272 = vrcp.f32 %v708_v62  ;;  %v720_v1 = vadd.f32 1.0, %v1265_v63 }
 0x159   :  { %1274 = vtanh.f32 %v696_v61  ;;  %v1267_v3 = vpop.eup %1266 }
 0x15a   :  { %1276 = vrcp.f32 %v720_v1  ;;  %v709_v5 = vadd.f32 1.0, %v1267_v3 }
 0x15b   :  { %v1269_v4 = vpop.eup %1268  ;;  %1278 = vpow2.f32 %v1089_v0  ;;  %v900_v0 = vld [vmem:[#allocation4 + $0x8] sm:$0xff] }
 0x15c   :  { %1280 = vtanh.f32 %v700_v2  ;;  %v721_v7 = vadd.f32 1.0, %v1269_v4  ;;  %v1271_v8 = vpop.eup %1270 }
 0x15d   :  { %1282 = vrcp.f32 %v709_v5  ;;  %v734_v13 = vadd.f32 1.0, %v1271_v8 }
 0x15e   :  { %1284 = vrcp.f32 %v721_v7 }
 0x15f   :  { %1286 = vrcp.f32 %v734_v13 }
 0x165   :  { %v1273_v9 = vpop.eup %1272 }
 0x166   :  { %v1275_v11 = vpop.eup %1274 }
 0x167   :  { %v1277_v12 = vpop.eup %1276  ;;  %v744_v15 = vmul.f32 %v1275_v11, %v1273_v9 }
 0x168   :  { %v1279_v14 = vpop.eup %1278  ;;  %v742_v16 = vmul.f32 %v1277_v12, %v740_v10 }
 0x169   :  { %v1281_v17 = vpop.eup %1280  ;;  %v735_v22 = vadd.f32 1.0, %v1279_v14 }
 0x16a   :  { %v1283_v19 = vpop.eup %1282  ;;  %v746_v20 = vadd.f32 %v744_v15, %v742_v16 }
 0x16b   :  { %v1285_v21 = vpop.eup %1284  ;;  %v745_v23 = vmul.f32 %v1283_v19, %v1281_v17 }
 0x16c   :  { %1288 = vtanh.f32 %v746_v20  ;;  %754 = vst [vmem:[#allocation17] sm:$0xff] %v746_v20  ;;  %v743_v24 = vmul.f32 %v1285_v21, %v741_v18  ;;  %v1287_v26 = vpop.eup %1286 }
 0x16d   :  { %1290 = vrcp.f32 %v735_v22 }
 0x16e   :  { %v747_v25 = vadd.f32 %v745_v23, %v743_v24 }
 0x170   :  { %1292 = vtanh.f32 %v747_v25  ;;  %755 = vst [vmem:[#allocation17 + $0x8] sm:$0xff] %v747_v25 }
 0x179   :  { %v1289_v27 = vpop.eup %1288 }
 0x17a   :  { %v750_v28 = vmul.f32 %v1289_v27, %v1287_v26  ;;  %v1291_v29 = vpop.eup %1290 }
 0x17c   :  { %752 = vst [vmem:[#allocation15] sm:$0xff] %v750_v28 }
 0x17d   :  { %v1293_v30 = vpop.eup %1292 }
 0x17e   :  { %v751_v31 = vmul.f32 %v1293_v30, %v1291_v29 }
 0x180   :  { %v1107_v32 = vpack.c.bf16 %v751_v31, %v750_v28  ;;  %753 = vst [vmem:[#allocation15 + $0x8] sm:$0xff] %v751_v31 }
 0x182   :  { %1108 = vst [vmem:[#allocation2] sm:$0xff] %v1107_v32  }
 0x189   :  { %v1261_v33 = vld [vmem:[#allocation2] sm:$0xff]  }
 0x18a   :  { %1135 = vmatmul.mubr.bf16.vlgmr.msra.gmra.mxu0 %v1261_v33 }
 0x24a   :  { %v884_v36 = vpop.f32.mrf.mxu0 }
 0x24b   :  { %v1619_v37 = vadd.f32 %v1092_v35, %v884_v36 }
 0x24c   :  { %v1136_v38 = vpop.f32.mrf.mxu0 }
 0x24d   :  { %893 = vmax.xlane.f32.xlu0 %v1619_v37 }
 0x24e   :  { %v887_v39 = vpop.f32.mrf.mxu0 }
 0x24f   :  { %v1622_v40 = vadd.f32 %v1092_v35, %v887_v39 }
 0x250   :  { %v1137_v41 = vpop.f32.mrf.mxu0 }
 0x251   :  { %895 = vmax.xlane.f32.xlu0 %v1622_v40 }
 0x2d6   :  { %v894_v43 = vpop.xlane.xlu0 %893 }
 0x2d7   :  { %v897_v44 = vmax.f32 %v891_v42, %v894_v43 }
 0x2d9   :  { %v901_v45 = vsub.f32 %v891_v42, %v897_v44  ;;  %934 = vst.msk [vmem:[#allocation3] sm:$0xff] %vm766_vm1, %v897_v44  ;;  %911 = vperm.xlu1 %1154, %v897_v44  }
 0x2da   :  { %v896_v46 = vpop.xlane.xlu0 %895 }
 0x2db   :  { %v898_v47 = vmax.f32 %v892_v6, %v896_v46  ;;  %v903_v57 = vmul.f32 1.442695, %v901_v45 }
 0x2dd   :  { %v902_v48 = vsub.f32 %v892_v6, %v898_v47  ;;  %935 = vst.msk [vmem:[#allocation3 + $0x8] sm:$0xff] %vm766_vm1, %v898_v47  ;;  %916 = vperm.xlu1 %1154, %v898_v47  }
 0x2df   :  { %v905_v58 = vmul.f32 1.442695, %v902_v48 }
 0x2e0   :  { %v943_v10 = vld [vmem:[#allocation3] sm:$0xff] }
 0x2e4   :  { %v944_v14 = vld [vmem:[#allocation3 + $0x8] sm:$0xff] }
 0x354   :  { %v912_v49 = vpop.permute.xlu1 %911 }
 0x355   :  { %v919_v50 = vsub.f32 %v1619_v37, %v912_v49 }
 0x357   :  { %v921_v51 = vmul.f32 1.442695, %v919_v50 }
 0x358   :  { %v917_v52 = vpop.permute.xlu1 %916 }
 0x359   :  { %1294 = vpow2.f32 %v921_v51  ;;  %v920_v53 = vsub.f32 %v1622_v40, %v917_v52 }
 0x35b   :  { %v923_v54 = vmul.f32 1.442695, %v920_v53 }
 0x35d   :  { %1296 = vpow2.f32 %v923_v54 }
 0x35e   :  { %1298 = vpow2.f32 %v903_v57 }
 0x35f   :  { %1300 = vpow2.f32 %v905_v58 }
 0x366   :  { %v1295_v55 = vpop.eup %1294 }
 0x367   :  { %925 = vadd.xlane.f32.xlu0 %v1295_v55 }
 0x36a   :  { %v1297_v56 = vpop.eup %1296 }
 0x36b   :  { %927 = vadd.xlane.f32.xlu1 %v1297_v56  ;;  %v1299_v59 = vpop.eup %1298 }
 0x36c   :  { %v907_v61 = vmul.f32 %v1299_v59, %v899_v60  ;;  %v1301_v62 = vpop.eup %1300 }
 0x36d   :  { %v908_v2 = vmul.f32 %v1301_v62, %v900_v0 }
 0x3f0   :  { %v926_v63 = vpop.xlane.xlu0 %925 }
 0x3f1   :  { %v929_v1 = vadd.f32 %v926_v63, %v907_v61 }
 0x3f3   :  { %932 = vst.msk [vmem:[#allocation4] sm:$0xff] %vm766_vm1, %v929_v1 }
 0x3f4   :  { %v928_v3 = vpop.xlane.xlu1 %927 }
 0x3f5   :  { %v930_v4 = vadd.f32 %v928_v3, %v908_v2 }
 0x3f7   :  { %933 = vst.msk [vmem:[#allocation4 + $0x8] sm:$0xff] %vm766_vm1, %v930_v4 }
 0x3fa   :  { %v945_v5 = vld [vmem:[#allocation4] sm:$0xff] }
 0x3fb   :  { %1302 = vlog2.f32 %v945_v5 }
 0x3fe   :  { %v946_v7 = vld [vmem:[#allocation4 + $0x8] sm:$0xff] }
 0x3ff   :  { %1304 = vlog2.f32 %v946_v7 }
 0x408   :  { %v1303_v8 = vpop.eup %1302 }
 0x409   :  { %v948_v9 = vmul.f32 0.6931472, %v1303_v8 }
 0x40b   :  { %v951_v11 = vadd.f32 %v948_v9, %v943_v10 }
 0x40c   :  { %v1305_v12 = vpop.eup %1304 }
 0x40d   :  { %957 = vperm.xlu0 %1155, %v951_v11   ;;  %v950_v13 = vmul.f32 0.6931472, %v1305_v12 }
 0x40f   :  { %v952_v15 = vadd.f32 %v950_v13, %v944_v14 }
 0x411   :  { %962 = vperm.xlu1 %1154, %v952_v15  }
 0x412   :  { %1417 = shalt.err (!%p1414_p1)
}
 0x413   :  { %992 = dma.vmem_to_hbm [thread:$0]  %s987_s15, 256, %s1660_s9, [#allocation16], %s1477_s16, %s1477_s16, %s1478_s17  }
 0x414   :  { %s1490_s20 = smov [#allocation17]  }
 0x415   :  { %s998_s3 = sshll.u32 %s1490_s20, 4  ;;  %s999_s3 = int_to_ptr.vmem [resolvable:$true] %s998_s3 }
 0x416   :  { %s1426_s5 = scalar_lea.vmem %s999_s3, 256  ;;  %p1431_p3 = scmp.lt.s32.totalorder %s999_s3, %s999_s3 }
 0x417   :  { %p1427_p2 = scmp.ne.s32.totalorder %s999_s3, %s1426_s5  ;;  %p1432_p4 = scmp.lt.s32.totalorder %s1426_s5, %s1426_s5 }
 0x419   :  { %p1433_p5 = por %p1432_p4, %p1431_p3 }
 0x41b   :  { %p1434_p6 = pnand %p1433_p5, %p1427_p2 }
 0x41d   :  { %1437 = shalt.err (!%p1434_p6)
}
 0x41e   :  { %1004 = dma.vmem_to_hbm [thread:$0]  %s999_s3, 256, %s1661_s10, [#allocation16], %s1477_s16, %s1477_s16, %s1478_s17  }
 0x41f   :  { %s1491_s9 = smov [#allocation14]  }
 0x420   :  { %s974_s23 = sshll.u32 %s1491_s9, 4  ;;  %s975_s23 = int_to_ptr.vmem [resolvable:$true] %s974_s23 }
 0x421   :  { %s1446_s24 = scalar_lea.vmem %s975_s23, 256  ;;  %p1451_p8 = scmp.lt.s32.totalorder %s975_s23, %s975_s23 }
 0x422   :  { %p1447_p7 = scmp.ne.s32.totalorder %s975_s23, %s1446_s24  ;;  %p1452_p9 = scmp.lt.s32.totalorder %s1446_s24, %s1446_s24 }
 0x424   :  { %p1453_p10 = por %p1452_p9, %p1451_p8 }
 0x426   :  { %p1454_p11 = pnand %p1453_p10, %p1447_p7 }
 0x488   :  { %v958_v16 = vpop.permute.xlu0 %957 }
 0x489   :  { %v965_v17 = vsub.f32 %v1619_v37, %v958_v16 }
 0x48b   :  { %967 = vst [vmem:[#allocation14] sm:$0xff] %v965_v17 }
 0x48c   :  { %v963_v18 = vpop.permute.xlu1 %962 }
 0x48d   :  { %v966_v19 = vsub.f32 %v1622_v40, %v963_v18 }
 0x48f   :  { %968 = vst [vmem:[#allocation14 + $0x8] sm:$0xff] %v966_v19 }
 0x490   :  { %1457 = shalt.err (!%p1454_p11)
}
 0x491   :  { %980 = dma.vmem_to_hbm [thread:$0]  %s975_s23, 256, %s1659_s8, [#allocation7], %s1477_s16, %s1477_s16, %s1478_s17  }
 0x492   :  { %1472 = dma.done.wait [#allocation7], 256  }
 0x493   :  { %1473 = vsyncadd [#allocation7], 4294967040 }
 0x494   :  { %1474 = dma.done.wait [#allocation16], 512  }
 0x495   :  { %1475 = vsyncadd [#allocation16], 4294966784 }
 0x496   :  { %1014 = vsyncpa [#allocation6], 1 }
 0x497   :  { %1015 = vsyncpa [#allocation9], 1 }
 0x498   :  { %1016 = vsyncpa [#allocation12], 1 }
 0x499   :  { %1017 = vsyncpa [#allocation7], 1 }
 0x49a   :  { %1018 = vsyncpa [#allocation16], 1 }

</bundles_post_ra>
